<compile_context>
chip_gen: v7x
topology: tpu7x:2x2x1
jax: 0.10.0
libtpu: 0.0.40
codegen_flags: <defaults>
</compile_context>

<pallas_src>
import functools

import jax
import jax.numpy as jnp
import numpy as np
from jax.experimental import pallas as pl
from jax.experimental.pallas import tpu as pltpu

_NEG = -1e30  # finite stand-in for -inf (Python float -> not a captured const)


def _softplus(x):
    # Matches torch.nn.functional.softplus (threshold=20) to < 2e-9.
    safe = jnp.minimum(x, 20.0)
    return jnp.where(x > 20.0, x, jnp.log1p(jnp.exp(safe)))


# ---------------------------------------------------------------------------
# Router kernel: fused noisy logits -> top-k mask -> softmax gates.
# Runs once over token blocks, hoisted out of the expert grid.  Kept in f32
# (tiny vs. the expert MLPs) so top-k selection matches the dense reference.
# ---------------------------------------------------------------------------
def router_kernel(x_ref, noise_ref, wrn_ref, brn_ref, gates_ref, *, top_k,
                  num_experts):
    x = x_ref[...]
    # One fused matmul for [route | noise] logits: E << 128 lanes, so two
    # separate dots would each waste most of an MXU pass.
    both = jnp.dot(x, wrn_ref[...],
                   preferred_element_type=jnp.float32) + brn_ref[...]
    logits = both[:, :num_experts]
    nlogits = both[:, num_experts:]
    noisy = logits + noise_ref[...] * _softplus(nlogits)

    colf = jax.lax.broadcasted_iota(jnp.int32, noisy.shape, 1).astype(jnp.float32)

    # Peel off the max `top_k` times (static unroll; top_k is a Python int).
    # Ties break on the lowest column index, matching lax.top_k / torch.topk.
    masked = jnp.full_like(noisy, _NEG)
    work = noisy
    for _ in range(top_k):
        m = jnp.max(work, axis=-1, keepdims=True)
        is_max = work == m
        first = jnp.min(jnp.where(is_max, colf, float(num_experts)),
                        axis=-1, keepdims=True)
        sel = colf == first
        masked = jnp.where(sel, noisy, masked)
        work = jnp.where(sel, _NEG, work)

    # Softmax over the sparse logits; exp(_NEG - mx) underflows to exactly 0
    # in f32, so unselected experts receive an exact 0 gate.
    mx = jnp.max(masked, axis=-1, keepdims=True)
    ex = jnp.exp(masked - mx)
    gates_ref[...] = ex / jnp.sum(ex, axis=-1, keepdims=True)


# ---------------------------------------------------------------------------
# Expert kernel: grid = (token blocks, experts).  Accumulates gate-weighted
# expert MLP outputs directly into the resident f32 output block; the expert
# axis is the innermost ("arbitrary") grid axis so x / gates / out / weights
# stay resident across it.
# ---------------------------------------------------------------------------
def moe_expert_kernel(counts_ref, x_ref, gates_ref,
                      w1_ref, b1_ref, w2_ref, b2_ref,
                      out_ref, *, num_experts, weights_resident):
    t = pl.program_id(0)
    e = pl.program_id(1)

    @pl.when(e == 0)
    def _init():
        out_ref[...] = jnp.zeros_like(out_ref)

    # Skip the MXU work when no token in this block routed to expert e (its
    # gate column is exactly 0, so skipping is bit-exact).
    @pl.when(counts_ref[t * num_experts + e] > 0)
    def _expert():
        if weights_resident:
            w1, b1 = w1_ref[e], b1_ref[e]
            w2, b2 = w2_ref[e], b2_ref[e]
        else:
            w1, b1 = w1_ref[...], b1_ref[...]
            w2, b2 = w2_ref[...], b2_ref[...]

        x = x_ref[...]                                   # bf16
        h = jnp.maximum(
            jnp.dot(x, w1, preferred_element_type=jnp.float32) + b1, 0.0)
        y = (jnp.dot(h.astype(jnp.bfloat16), w2,
                     preferred_element_type=jnp.float32) + b2)
        # TODO(synk): nn.Dropout(0.1) treated as eval-mode identity (inference).

        # Select gate column e from the resident (tm, E) f32 gate block.
        lane = jax.lax.broadcasted_iota(jnp.int32, gates_ref.shape, 1)
        g = jnp.sum(jnp.where(lane == e, gates_ref[...], 0.0),
                    axis=-1, keepdims=True)
        out_ref[...] += y * g


# ---------------------------------------------------------------------------
# Host-side wrapper
# ---------------------------------------------------------------------------
def _pick_token_tile(n, desired=512):
    """Largest multiple-of-16 divisor of n that is <= desired, keeping >= 2
    token blocks when possible (v7x has 2 TensorCores on the parallel axis)."""
    d = min(desired, n)
    d -= d % 16
    tm = None
    while d >= 16:
        if n % d == 0:
            tm = d
            break
        d -= 16
    if tm is None:
        return n
    if tm == n and n >= 32 and (n // 2) % 16 == 0:
        tm = n // 2
    return tm


def _vmem_capacity_bytes():
    try:
        return int(pltpu.get_tpu_info().vmem_capacity_bytes)
    except Exception:
        return 64 << 20  # conservative fallback (v7x per-TensorCore VMEM)


def sparse_moe_forward(x, params, noise, top_k, *, token_tile=512):
    B, T, C = x.shape
    N = B * T
    E = params["wr"].shape[1]
    H = params["w1"].shape[2]
    assert N % 16 == 0, "token count must be a multiple of 16 (bf16 sublanes)"

    xf = x.reshape(N, C).astype(jnp.float32)
    tm = _pick_token_tile(N, token_tile)
    n_blocks = N // tm

    # ---- router (f32: exact top-k parity with the dense reference) ----
    wrn = jnp.concatenate([params["wr"], params["wn"]], axis=1)   # (C, 2E)
    brn = jnp.concatenate([params["br"], params["bn"]], axis=1)   # (1, 2E)
    gates = pl.pallas_call(
        functools.partial(router_kernel, top_k=top_k, num_experts=E),
        out_shape=jax.ShapeDtypeStruct((N, E), jnp.float32),
        grid_spec=pltpu.PrefetchScalarGridSpec(
            num_scalar_prefetch=0,
            grid=(n_blocks,),
            in_specs=[
                pl.BlockSpec((tm, C), lambda t: (t, 0)),      # x
                pl.BlockSpec((tm, E), lambda t: (t, 0)),      # router noise
                pl.BlockSpec((C, 2 * E), lambda t: (0, 0)),   # [W_route|W_noise]
                pl.BlockSpec((1, 2 * E), lambda t: (0, 0)),   # [b_route|b_noise]
            ],
            out_specs=pl.BlockSpec((tm, E), lambda t: (t, 0)),
        ),
        compiler_params=pltpu.CompilerParams(
            dimension_semantics=("parallel",)),
    )(xf, noise.astype(jnp.float32), wrn, brn)

    # Per-(token-block, expert) routed-token counts, flattened to 1D so the
    # SMEM prefetch buffer is not lane-padded to 128 columns.
    counts = jnp.sum((gates > 0.0).reshape(n_blocks, tm, E),
                     axis=1).astype(jnp.int32).reshape(-1)

    # ---- expert grid: bf16 MXU operands, f32 accumulation ----
    xf_bf = xf.astype(jnp.bfloat16)
    w1 = params["w1"].astype(jnp.bfloat16)
    w2 = params["w2"].astype(jnp.bfloat16)
    b1 = params["b1"].astype(jnp.float32)
    b2 = params["b2"].astype(jnp.float32)

    bf16_b, f32_b = 2, 4
    vmem_cap = _vmem_capacity_bytes()
    weight_bytes = E * (C * H + H * C) * bf16_b + E * (H + C) * f32_b
    per_tok_bytes = tm * C * bf16_b + tm * E * f32_b + tm * C * f32_b
    # 2x: Pallas double-buffers pipelined blocks (constant-index blocks are
    # only DMA'd once but budget conservatively).
    resident_need = 2 * weight_bytes + 2 * per_tok_bytes
    weights_resident = resident_need <= int(0.7 * vmem_cap)

    if weights_resident:
        # Whole weight stacks loaded once (constant index_map), indexed with
        # w_ref[e] in-kernel -> weights never re-stream from HBM.
        w_specs = [
            pl.BlockSpec((E, C, H), lambda t, e, cnt: (0, 0, 0)),   # W1
            pl.BlockSpec((E, 1, H), lambda t, e, cnt: (0, 0, 0)),   # b1
            pl.BlockSpec((E, H, C), lambda t, e, cnt: (0, 0, 0)),   # W2
            pl.BlockSpec((E, 1, C), lambda t, e, cnt: (0, 0, 0)),   # b2
        ]
        need = resident_need
    else:
        # TODO(synk): for weights that overflow VMEM, switch to grouped
        # (sorted-by-expert) dispatch with scalar-prefetched group offsets so
        # each expert's weights stream from HBM exactly once; this fallback
        # streams them once per token block.
        w_specs = [
            pl.BlockSpec((None, C, H), lambda t, e, cnt: (e, 0, 0)),
            pl.BlockSpec((None, 1, H), lambda t, e, cnt: (e, 0, 0)),
            pl.BlockSpec((None, H, C), lambda t, e, cnt: (e, 0, 0)),
            pl.BlockSpec((None, 1, C), lambda t, e, cnt: (e, 0, 0)),
        ]
        need = 2 * (weight_bytes // E) + 2 * per_tok_bytes

    vmem_limit = int(min(max(2 * need, 16 << 20), int(0.85 * vmem_cap)))

    out = pl.pallas_call(
        functools.partial(moe_expert_kernel, num_experts=E,
                          weights_resident=weights_resident),
        out_shape=jax.ShapeDtypeStruct((N, C), jnp.float32),
        grid_spec=pltpu.PrefetchScalarGridSpec(
            num_scalar_prefetch=1,                       # counts -> SMEM
            grid=(n_blocks, E),
            in_specs=[
                pl.BlockSpec((tm, C), lambda t, e, cnt: (t, 0)),   # x (bf16)
                pl.BlockSpec((tm, E), lambda t, e, cnt: (t, 0)),   # gates (f32)
            ] + w_specs,
            out_specs=pl.BlockSpec((tm, C), lambda t, e, cnt: (t, 0)),
        ),
        compiler_params=pltpu.CompilerParams(
            dimension_semantics=("parallel", "arbitrary"),
            vmem_limit_bytes=vmem_limit),
    )(counts, xf_bf, gates, w1, b1, w2, b2)
    return out.reshape(B, T, C)


# ---------------------------------------------------------------------------
# Init + pure-JAX reference (PyTorch SparseMoE.forward, eval mode)
# ---------------------------------------------------------------------------
def init_params(key, n_embed, num_experts):
    """Deterministic PyTorch-Linear-style init (uniform +-1/sqrt(fan_in))."""
    hidden = 4 * n_embed
    ks = jax.random.split(key, 8)

    def lin(k, fan_in, shape):
        bound = 1.0 / np.sqrt(fan_in)
        return jax.random.uniform(k, shape, jnp.float32, -bound, bound)

    return dict(
        wr=lin(ks[0], n_embed, (n_embed, num_experts)),
        br=lin(ks[1], n_embed, (1, num_experts)),
        wn=lin(ks[2], n_embed, (n_embed, num_experts)),
        bn=lin(ks[3], n_embed, (1, num_experts)),
        w1=lin(ks[4], n_embed, (num_experts, n_embed, hidden)),
        b1=lin(ks[5], n_embed, (num_experts, 1, hidden)),
        w2=lin(ks[6], hidden, (num_experts, hidden, n_embed)),
        b2=lin(ks[7], hidden, (num_experts, 1, n_embed)),
    )


def ref_forward(x, params, noise, top_k):
    B, T, C = x.shape
    E = params["wr"].shape[1]
    xf = x.reshape(-1, C)
    logits = xf @ params["wr"] + params["br"][0]
    nlogits = xf @ params["wn"] + params["bn"][0]
    noisy = logits + noise * jax.nn.softplus(nlogits)
    topv, topi = jax.lax.top_k(noisy, top_k)
    rows = jnp.arange(xf.shape[0])[:, None]
    sparse = jnp.full_like(noisy, -jnp.inf).at[rows, topi].set(topv)
    gates = jax.nn.softmax(sparse, axis=-1)
    out = jnp.zeros_like(xf)
    for e in range(E):
        h = jnp.maximum(xf @ params["w1"][e] + params["b1"][e, 0], 0.0)
        y = h @ params["w2"][e] + params["b2"][e, 0]
        out = out + y * gates[:, e:e + 1]
    return out.reshape(B, T, C)


if __name__ == "__main__":
    n_embd, num_experts, top_k = 16, 8, 2
    B, T = 4, 8

    key = jax.random.PRNGKey(0)
    kx, kn, kp = jax.random.split(key, 3)
    x = jax.random.normal(kx, (B, T, n_embd), jnp.float32)        # mh_output
    # torch.randn_like router noise, passed explicitly for determinism
    noise = jax.random.normal(kn, (B * T, num_experts), jnp.float32)
    params = init_params(kp, n_embd, num_experts)

    out = sparse_moe_forward(x, params, noise, top_k)
    out = jax.block_until_ready(out)

    ref = ref_forward(x, params, noise, top_k)
    # bf16 MXU operands in the expert MLPs -> compare at bf16-appropriate tol;
    # routing/gates are f32 and match the reference exactly.
    np.testing.assert_allclose(np.asarray(out), np.asarray(ref),
                               rtol=2e-2, atol=2e-2)
    print("KERNEL_OK")
</pallas_src>

<mosaic_0001>
module attributes {stable_mosaic.version = 11 : i64} {
  func.func @router_kernel(%arg0: i32, %arg1: memref<16x16xf32, #tpu.memory_space<vmem>>, %arg2: memref<16x8xf32, #tpu.memory_space<vmem>>, %arg3: memref<16x16xf32, #tpu.memory_space<vmem>>, %arg4: memref<1x16xf32, #tpu.memory_space<vmem>>, %arg5: memref<16x8xf32, #tpu.memory_space<vmem>>) attributes {dimension_semantics = [#tpu.dimension_semantics<parallel>], iteration_bounds = array<i64: 2>, scalar_prefetch = 0 : i64, scratch_operands = 0 : i64, tpu.core_type = #tpu.core_type<tc>, window_params = [{transform_indices = @transform_0, window_bounds = array<i64: 16, 16>}, {transform_indices = @transform_1, window_bounds = array<i64: 16, 8>}, {pipeline_mode = #tpu.pipeline_mode<synchronous>, transform_indices = @transform_2, window_bounds = array<i64: 16, 16>}, {pipeline_mode = #tpu.pipeline_mode<synchronous>, transform_indices = @transform_3, window_bounds = array<i64: 1, 16>}, {transform_indices = @transform_4, window_bounds = array<i64: 16, 8>}]} {
    %c0 = arith.constant 0 : index
    %c0_0 = arith.constant 0 : index
    %0 = vector.load %arg1[%c0, %c0_0] : memref<16x16xf32, #tpu.memory_space<vmem>>, vector<16x16xf32>
    %c0_1 = arith.constant 0 : index
    %c0_2 = arith.constant 0 : index
    %1 = vector.load %arg3[%c0_1, %c0_2] : memref<16x16xf32, #tpu.memory_space<vmem>>, vector<16x16xf32>
    %cst = arith.constant dense<0.000000e+00> : vector<16x16xf32>
    %2 = tpu.matmul %0, %1, %cst {dimension_numbers = #tpu.dot_dimension_numbers<[1], [0], [0], [1], [0, 0, 1, 1], [], []>} : vector<16x16xf32>, vector<16x16xf32>, vector<16x16xf32> -> vector<16x16xf32>
    %c0_3 = arith.constant 0 : index
    %c0_4 = arith.constant 0 : index
    %3 = vector.load %arg4[%c0_3, %c0_4] : memref<1x16xf32, #tpu.memory_space<vmem>>, vector<1x16xf32>
    %4 = vector.broadcast %3 : vector<1x16xf32> to vector<16x16xf32>
    %5 = arith.addf %2, %4 : vector<16x16xf32>
    %6 = vector.extract_strided_slice %5 {offsets = [0, 0], sizes = [16, 8], strides = [1, 1]} : vector<16x16xf32> to vector<16x8xf32>
    %7 = vector.extract_strided_slice %5 {offsets = [0, 8], sizes = [16, 8], strides = [1, 1]} : vector<16x16xf32> to vector<16x8xf32>
    %c0_5 = arith.constant 0 : index
    %c0_6 = arith.constant 0 : index
    %8 = vector.load %arg2[%c0_5, %c0_6] : memref<16x8xf32, #tpu.memory_space<vmem>>, vector<16x8xf32>
    %cst_7 = arith.constant 2.000000e+01 : f32
    %9 = vector.broadcast %cst_7 : f32 to vector<16x8xf32>
    %10 = arith.minimumf %7, %9 : vector<16x8xf32>
    %cst_8 = arith.constant 2.000000e+01 : f32
    %11 = vector.broadcast %cst_8 : f32 to vector<16x8xf32>
    %12 = arith.cmpf ogt, %7, %11 : vector<16x8xf32>
    %13 = math.exp %10 : vector<16x8xf32>
    %14 = math.log1p %13 : vector<16x8xf32>
    %15 = arith.select %12, %7, %14 : vector<16x8xi1>, vector<16x8xf32>
    %16 = arith.mulf %8, %15 : vector<16x8xf32>
    %17 = arith.addf %6, %16 : vector<16x8xf32>
    %18 = tpu.iota {dimensions = array<i32: 1>} : vector<16x8xi32>
    %19 = arith.sitofp %18 : vector<16x8xi32> to vector<16x8xf32>
    %cst_9 = arith.constant -1.000000e+30 : f32
    %20 = vector.broadcast %cst_9 : f32 to vector<16x8xf32>
    %cst_10 = arith.constant dense<0xFF800000> : vector<16xf32>
    %21 = vector.multi_reduction <maximumf>, %17, %cst_10 [1] : vector<16x8xf32> to vector<16xf32>
    %22 = vector.shape_cast %21 : vector<16xf32> to vector<16x1xf32>
    %23 = vector.broadcast %22 : vector<16x1xf32> to vector<16x8xf32>
    %24 = arith.cmpf oeq, %17, %23 : vector<16x8xf32>
    %cst_11 = arith.constant 8.000000e+00 : f32
    %25 = vector.broadcast %cst_11 : f32 to vector<16x8xf32>
    %26 = arith.select %24, %19, %25 : vector<16x8xi1>, vector<16x8xf32>
    %cst_12 = arith.constant dense<0x7F800000> : vector<16xf32>
    %27 = vector.multi_reduction <minimumf>, %26, %cst_12 [1] : vector<16x8xf32> to vector<16xf32>
    %28 = vector.shape_cast %27 : vector<16xf32> to vector<16x1xf32>
    %29 = vector.broadcast %28 : vector<16x1xf32> to vector<16x8xf32>
    %30 = arith.cmpf oeq, %19, %29 : vector<16x8xf32>
    %31 = arith.select %30, %17, %20 : vector<16x8xi1>, vector<16x8xf32>
    %cst_13 = arith.constant -1.000000e+30 : f32
    %32 = vector.broadcast %cst_13 : f32 to vector<16x8xf32>
    %33 = arith.select %30, %32, %17 : vector<16x8xi1>, vector<16x8xf32>
    %cst_14 = arith.constant dense<0xFF800000> : vector<16xf32>
    %34 = vector.multi_reduction <maximumf>, %33, %cst_14 [1] : vector<16x8xf32> to vector<16xf32>
    %35 = vector.shape_cast %34 : vector<16xf32> to vector<16x1xf32>
    %36 = vector.broadcast %35 : vector<16x1xf32> to vector<16x8xf32>
    %37 = arith.cmpf oeq, %33, %36 : vector<16x8xf32>
    %cst_15 = arith.constant 8.000000e+00 : f32
    %38 = vector.broadcast %cst_15 : f32 to vector<16x8xf32>
    %39 = arith.select %37, %19, %38 : vector<16x8xi1>, vector<16x8xf32>
    %cst_16 = arith.constant dense<0x7F800000> : vector<16xf32>
    %40 = vector.multi_reduction <minimumf>, %39, %cst_16 [1] : vector<16x8xf32> to vector<16xf32>
    %41 = vector.shape_cast %40 : vector<16xf32> to vector<16x1xf32>
    %42 = vector.broadcast %41 : vector<16x1xf32> to vector<16x8xf32>
    %43 = arith.cmpf oeq, %19, %42 : vector<16x8xf32>
    %44 = arith.select %43, %17, %31 : vector<16x8xi1>, vector<16x8xf32>
    %cst_17 = arith.constant dense<0xFF800000> : vector<16xf32>
    %45 = vector.multi_reduction <maximumf>, %44, %cst_17 [1] : vector<16x8xf32> to vector<16xf32>
    %46 = vector.shape_cast %45 : vector<16xf32> to vector<16x1xf32>
    %47 = vector.broadcast %46 : vector<16x1xf32> to vector<16x8xf32>
    %48 = arith.subf %44, %47 : vector<16x8xf32>
    %49 = math.exp %48 : vector<16x8xf32>
    %cst_18 = arith.constant dense<0.000000e+00> : vector<16xf32>
    %50 = vector.multi_reduction <add>, %49, %cst_18 [1] : vector<16x8xf32> to vector<16xf32>
    %51 = vector.shape_cast %50 : vector<16xf32> to vector<16x1xf32>
    %52 = vector.broadcast %51 : vector<16x1xf32> to vector<16x8xf32>
    %53 = arith.divf %49, %52 : vector<16x8xf32>
    %c0_19 = arith.constant 0 : index
    %c0_20 = arith.constant 0 : index
    %54 = vector.load %arg5[%c0_19, %c0_20] : memref<16x8xf32, #tpu.memory_space<vmem>>, vector<16x8xf32>
    tpu.vector_store %arg5[%c0_19, %c0_20], %53 {strides = array<i32>} : memref<16x8xf32, #tpu.memory_space<vmem>>, vector<16x8xf32>,
    return
  }
  func.func @transform_0(%arg0: i32) -> (i32, i32) {
    %c0_i32 = arith.constant 0 : i32
    %c0_i32_0 = arith.constant 0 : i32
    return %arg0, %c0_i32 : i32, i32
  }
  func.func @transform_1(%arg0: i32) -> (i32, i32) {
    %c0_i32 = arith.constant 0 : i32
    %c0_i32_0 = arith.constant 0 : i32
    return %arg0, %c0_i32 : i32, i32
  }
  func.func @transform_2(%arg0: i32) -> (i32, i32) {
    %c0_i32 = arith.constant 0 : i32
    %c0_i32_0 = arith.constant 0 : i32
    %c0_i32_1 = arith.constant 0 : i32
    return %c0_i32, %c0_i32_0 : i32, i32
  }
  func.func @transform_3(%arg0: i32) -> (i32, i32) {
    %c0_i32 = arith.constant 0 : i32
    %c0_i32_0 = arith.constant 0 : i32
    %c0_i32_1 = arith.constant 0 : i32
    return %c0_i32, %c0_i32_0 : i32, i32
  }
  func.func @transform_4(%arg0: i32) -> (i32, i32) {
    %c0_i32 = arith.constant 0 : i32
    %c0_i32_0 = arith.constant 0 : i32
    return %arg0, %c0_i32 : i32, i32
  }
}

</mosaic_0001>

<bundles_post_ra>
// kernel: tpu_custom_call.1
= control target key start
LH: loop header
LB: loop body
LE: loop exit
PB: predicated region body
PF: predicated region fallthrough
CT: control target
= control target key end

     0   :  { %s586_s15 = smov 0   ;;  %s638_s0 = inlined_call_operand.vmem [shape: f32[32,16], index: 0, kind: input, shape index: {}]   ;;  %s639_s1 = inlined_call_operand.vmem [shape: f32[32,8], index: 1, kind: input, shape index: {}]   ;;  %s640_s2 = inlined_call_operand.vmem [shape: f32[16,16], index: 2, kind: input, shape index: {}]   ;;  %s641_s3 = inlined_call_operand.vmem [shape: f32[1,16], index: 3, kind: input, shape index: {}]   ;;  %s642_s4 = inlined_call_operand.vmem [shape: f32[32,8], index: 4, kind: output, shape index: {}]  }
   0x1 LB: > { %s496_s16 = sadd.s32 4294967295, %s558_s15   ;;  %p500_p0 = scmp.ge.s32.totalorder %s558_s15, 1  ;;  %s558_s15 = sphi %s586_s15, %s14_s15  }
   0x2   : > { %p174_p1 = scmp.lt.s32.totalorder %s558_s15, 3 }
   0x4   : > { %p175_p2 = pnand %p500_p0, %p174_p1 }
   0x5   : > { %v225_v0 = vld [vmem:[%s640_s2] sm:$0xff] (!%p175_p2)  ;;  %v226_v1 = vld [vmem:[%s640_s2 + $0x8] sm:$0xff] (!%p175_p2)  ;;  %s501_s21 = sshll.u32 (!%p175_p2), %s496_s16, 1  ;;  %vm234_vm0 = vcmask (!%p175_p2), 130048   ;;  %s560_s28 = smov (!%p175_p2), 120   ;;  %vm361_vm5 = vcmask (!%p175_p2), 64512   ;;  %v358_v44 = vlaneseq (!%p175_p2) }
   0x6   : > { %178 = sbr.rel (%p175_p2) target bundleno = 1283 (0x503), region = 36  ;;  %v523_v2 = vpack.c.bf16 (!%p175_p2), %v226_v1, %v225_v0  ;;  %p206_p3 = scmp.lt.s32.totalorder (!%p175_p2), %s501_s21, 3  ;;  %v507_v5 = vld [vmem:[%s641_s3] ss:$0 sm:$0xff] (!%p175_p2) }
   0x7   : > { %v359_v45 = vand.u32 (!%p175_p2), 127, %v358_v44 }
   0x8   : > { %524 = vmatprep.subr.bf16.mxu0 (!%p175_p2), %v523_v2 }
   0x9   : > { %526 = vmatpush3.bf16.msra.mxu0 (!%p175_p2), %v523_v2  ;;  %v360_v46 = vcvt.s32.f32 (!%p175_p2), %v359_v45 }
   0xd   : > { %s644_s21 = smov (!%p206_p3, %s501_s21), 3 }
   0xe   : > { %s600_s22 = sshll.u32 %s644_s21, 3 }
   0xf   : > { %s209_s25 = scalar_lea.vmem %s638_s0, %s600_s22  ;;  %s215_s5 = scalar_lea.vmem %s639_s1, %s600_s22 }
  0x10   : > { %v223_v3 = vld [vmem:[%s209_s25] sm:$0xff]  ;;  %v224_v4 = vld [vmem:[%s209_s25 + $0x8] sm:$0xff]  ;;  %s221_s8 = scalar_lea.vmem %s642_s4, %s600_s22 }
  0x11   : > { %520 = vmatprep.mubr.msk.f32.mxu0 %vm234_vm0, %v223_v3  ;;  %v316_v34 = vld [vmem:[%s215_s5] sm:$0xff]  ;;  %v317_v37 = vld [vmem:[%s215_s5 + $0x8] sm:$0xff] }
  0x12   : > { %521 = vmatmul.mubr.msk.f32.vlgmr.msra.gmra.mrb[0].mxu0 %vm234_vm0, %v224_v4 }
  0xe5   : > { %v522_v6 = vpop.f32.mrb[0].mxu0 }
  0xe6   : > { %v313_v7 = vadd.f32 %v522_v6, %v507_v5  ;;  %v307_v8 = vpop.f32.mrb[1].mxu0 }
  0xe7   : > { %v308_v9 = vadd.f32 %v507_v5, %v307_v8 }
  0xe8   : > { %v319_v10 = vmin.f32 %v313_v7, 20.0  ;;  %vm321_vm4 = vcmp.gt.f32.partialorder %v313_v7, 20.0 }
  0xe9   : > { %v318_v11 = vmin.f32 %v308_v9, 20.0  ;;  %vm320_vm2 = vcmp.gt.f32.partialorder %v308_v9, 20.0 }
  0xea   : > { %v324_v12 = vmul.f32 1.442695, %v319_v10 }
  0xeb   : > { %v322_v13 = vmul.f32 1.442695, %v318_v11 }
  0xec   : > { %536 = vpow2.f32 %v324_v12 }
  0xed   : > { %538 = vpow2.f32 %v322_v13 }
  0xf6   : > { %v537_v14 = vpop.eup %536 }
  0xf7   : > { %v539_v15 = vpop.eup %538  ;;  %v335_v16 = vadd.f32 1.0, %v537_v14  ;;  %v338_v19 = vmul.f32 -0.5, %v537_v14  ;;  %v341_v25 = vand.u32 2147483647, %v537_v14 }
  0xf8   : > { %v326_v17 = vadd.f32 1.0, %v539_v15  ;;  %v329_v18 = vmul.f32 -0.5, %v539_v15  ;;  %v332_v21 = vand.u32 2147483647, %v539_v15 }
  0xf9   : > { %540 = vlog2.f32 %v335_v16  ;;  %v339_v23 = vadd.f32 1.0, %v338_v19  ;;  %vm342_vm3 = vcmp.lt.f32.partialorder %v341_v25, 0.0004427343 }
  0xfa   : > { %542 = vlog2.f32 %v326_v17  ;;  %v330_v20 = vadd.f32 1.0, %v329_v18  ;;  %vm333_vm1 = vcmp.lt.f32.partialorder %v332_v21, 0.0004427343 }
  0xfb   : > { %v340_v30 = vmul.f32 %v537_v14, %v339_v23 }
  0xfc   : > { %v331_v27 = vmul.f32 %v539_v15, %v330_v20 }
 0x103   : > { %v541_v22 = vpop.eup %540 }
 0x104   : > { %v543_v24 = vpop.eup %542  ;;  %v337_v28 = vmul.f32 0.6931472, %v541_v22 }
 0x105   : > { %v328_v26 = vmul.f32 0.6931472, %v543_v24 }
 0x106   : > { %v343_v32 = vsel %vm342_vm3, %v340_v30, %v337_v28 }
 0x107   : > { %v334_v29 = vsel %vm333_vm1, %v331_v27, %v328_v26  ;;  %v345_v33 = vsel %vm321_vm4, %v313_v7, %v343_v32 }
 0x108   : > { %v344_v31 = vsel %vm320_vm2, %v308_v9, %v334_v29 }
 0x109   : > { %348 = vrot.lane.b32.xlu0 %v344_v31, %s560_s28 }
 0x10d   : > { %350 = vrot.lane.b32.xlu0 %v345_v33, %s560_s28 }
 0x17b   : > { %v349_v35 = vpop.permute.xlu0 %348 }
 0x17c   : > { %v354_v36 = vmul.f32 %v349_v35, %v316_v34 }
 0x17e   : > { %v356_v38 = vadd.f32 %v354_v36, %v308_v9 }
 0x17f   : > { %v351_v39 = vpop.permute.xlu0 %350 }
 0x180   : > { %v355_v40 = vmul.f32 %v351_v39, %v317_v37  ;;  %v362_v41 = vsel %vm361_vm5, %v356_v38, -inf }
 0x181   : > { %363 = vmax.xlane.f32.xlu1 %v362_v41 }
 0x182   : > { %v357_v42 = vadd.f32 %v355_v40, %v313_v7 }
 0x184   : > { %v365_v43 = vsel %vm361_vm5, %v357_v42, -inf }
 0x185   : > { %366 = vmax.xlane.f32.xlu1 %v365_v43 }
 0x20e   : > { %v364_v47 = vpop.xlane.xlu1 %363 }
 0x20f   : > { %vm368_vm6 = vcmp.eq.f32.partialorder %v356_v38, %v364_v47 }
 0x210   : > { %v370_v48 = vsel %vm368_vm6, %v360_v46, 8.0 }
 0x211   : > { %v372_v49 = vsel %vm361_vm5, %v370_v48, inf }
 0x212   : > { %373 = vmin.xlane.f32.xlu0 %v372_v49  ;;  %v367_v50 = vpop.xlane.xlu1 %366 }
 0x213   : > { %vm369_vm7 = vcmp.eq.f32.partialorder %v357_v42, %v367_v50 }
 0x214   : > { %v371_v51 = vsel %vm369_vm7, %v360_v46, 8.0 }
 0x215   : > { %v375_v52 = vsel %vm361_vm5, %v371_v51, inf }
 0x216   : > { %376 = vmin.xlane.f32.xlu1 %v375_v52 }
 0x29f   : > { %v374_v53 = vpop.xlane.xlu0 %373 }
 0x2a0   : > { %vm378_vm8 = vcmp.eq.f32.partialorder %v360_v46, %v374_v53 }
 0x2a1   : > { %v382_v54 = vsel %vm378_vm8, -1e+30, %v356_v38  ;;  %v380_v2 = vsel %vm378_vm8, %v356_v38, -1e+30 }
 0x2a2   : > { %v384_v55 = vsel %vm361_vm5, %v382_v54, -inf }
 0x2a3   : > { %v377_v56 = vpop.xlane.xlu1 %376  ;;  %385 = vmax.xlane.f32.xlu1 %v384_v55 }
 0x2a4   : > { %vm379_vm9 = vcmp.eq.f32.partialorder %v360_v46, %v377_v56 }
 0x2a5   : > { %v383_v57 = vsel %vm379_vm9, -1e+30, %v357_v42  ;;  %v381_v6 = vsel %vm379_vm9, %v357_v42, -1e+30 }
 0x2a6   : > { %v387_v58 = vsel %vm361_vm5, %v383_v57, -inf }
 0x2a7   : > { %388 = vmax.xlane.f32.xlu1 %v387_v58 }
 0x330   : > { %v386_v59 = vpop.xlane.xlu1 %385 }
 0x331   : > { %vm390_vm10 = vcmp.eq.f32.partialorder %v382_v54, %v386_v59 }
 0x332   : > { %v392_v60 = vsel %vm390_vm10, %v360_v46, 8.0 }
 0x333   : > { %v394_v61 = vsel %vm361_vm5, %v392_v60, inf }
 0x334   : > { %395 = vmin.xlane.f32.xlu1 %v394_v61  ;;  %v389_v62 = vpop.xlane.xlu1 %388 }
 0x335   : > { %vm391_vm11 = vcmp.eq.f32.partialorder %v383_v57, %v389_v62 }
 0x336   : > { %v393_v63 = vsel %vm391_vm11, %v360_v46, 8.0 }
 0x337   : > { %v397_v0 = vsel %vm361_vm5, %v393_v63, inf }
 0x338   : > { %398 = vmin.xlane.f32.xlu1 %v397_v0 }
 0x3c1   : > { %v396_v1 = vpop.xlane.xlu1 %395 }
 0x3c2   : > { %vm400_vm12 = vcmp.eq.f32.partialorder %v360_v46, %v396_v1 }
 0x3c3   : > { %v402_v3 = vsel %vm400_vm12, %v356_v38, %v380_v2 }
 0x3c4   : > { %v404_v4 = vsel %vm361_vm5, %v402_v3, -inf }
 0x3c5   : > { %v399_v5 = vpop.xlane.xlu1 %398  ;;  %405 = vmax.xlane.f32.xlu1 %v404_v4 }
 0x3c6   : > { %vm401_vm13 = vcmp.eq.f32.partialorder %v360_v46, %v399_v5 }
 0x3c7   : > { %v403_v7 = vsel %vm401_vm13, %v357_v42, %v381_v6 }
 0x3c8   : > { %v407_v8 = vsel %vm361_vm5, %v403_v7, -inf }
 0x3c9   : > { %408 = vmax.xlane.f32.xlu1 %v407_v8 }
 0x452   : > { %v406_v9 = vpop.xlane.xlu1 %405 }
 0x453   : > { %v410_v10 = vsub.f32 %v402_v3, %v406_v9 }
 0x455   : > { %v412_v11 = vmul.f32 1.442695, %v410_v10 }
 0x456   : > { %v409_v12 = vpop.xlane.xlu1 %408 }
 0x457   : > { %544 = vpow2.f32 %v412_v11  ;;  %v411_v13 = vsub.f32 %v403_v7, %v409_v12 }
 0x459   : > { %v414_v14 = vmul.f32 1.442695, %v411_v13 }
 0x45b   : > { %546 = vpow2.f32 %v414_v14 }
 0x461   : > { %v545_v15 = vpop.eup %544 }
 0x462   : > { %v416_v16 = vsel %vm361_vm5, %v545_v15, 0.0 }
 0x463   : > { %417 = vadd.xlane.f32.xlu1 %v416_v16 }
 0x465   : > { %v547_v17 = vpop.eup %546 }
 0x466   : > { %v419_v18 = vsel %vm361_vm5, %v547_v17, 0.0 }
 0x467   : > { %420 = vadd.xlane.f32.xlu0 %v419_v18 }
 0x4f0   : > { %v418_v19 = vpop.xlane.xlu1 %417 }
 0x4f1   : > { %548 = vrcp.f32 %v418_v19 }
 0x4f4   : > { %v421_v20 = vpop.xlane.xlu0 %420 }
 0x4f5   : > { %550 = vrcp.f32 %v421_v20 }
 0x4fb   : > { %v549_v21 = vpop.eup %548 }
 0x4fc   : > { %v423_v22 = vmul.f32 %v549_v21, %v545_v15 }
 0x4fe   : > { %426 = vst.msk [vmem:[%s221_s8] sm:$0xff] %vm361_vm5, %v423_v22 }
 0x4ff   : > { %v551_v23 = vpop.eup %550 }
 0x500   : > { %v425_v24 = vmul.f32 %v551_v23, %v547_v17 }
 0x502   : > { %427 = vst.msk [vmem:[%s221_s8 + $0x8] sm:$0xff] %vm361_vm5, %v425_v24 }
 0x503 PF: > { %s14_s15 = sadd.s32 1, %s558_s15  }
 0x504   : > { %p11_p4 = scmp.ge.s32.totalorder %s14_s15, 4  }
 0x506   :  { %13 = sbr.rel (!%p11_p4) target bundleno = 1 (0x1), region = 69 }

</bundles_post_ra>
